<compile_context>
chip_gen: v7x
topology: tpu7x:2x2x1
jax: 0.10.0
libtpu: 0.0.40
codegen_flags: <defaults>
</compile_context>

<pallas_src>
import functools

import numpy as np

import jax
import jax.numpy as jnp
from jax import lax
from jax.experimental import pallas as pl
from jax.experimental.pallas import tpu as pltpu


_LANE = 128            # lane width of a vreg
_MAX_TILE_ROWS = 2048  # 2048*128*4B = 1 MiB per f32 input tile


def _round_up(x, m):
    return ((x + m - 1) // m) * m


# ----------------------------------------------------------------------------
# Pallas kernels
# ----------------------------------------------------------------------------

def _laplace_sums_kernel(d_ref, s_ref, m_ref, sum_l_ref, sum_m_ref, *,
                         rows_valid, tile_rows, part_off, mask_tail, mask_dup):
    """Fused L + partial sums of L and M_obs.

    Grid is (n_split, steps): axis 0 ("parallel") shards row tiles across
    TensorCores on v7x, axis 1 ("arbitrary") is the reduction sweep.  Each
    part accumulates into its own (8, 128) f32 VMEM-resident output block
    using only VPU adds; the cross-lane reduce happens in the wrapper.
    """
    i = pl.program_id(0)
    j = pl.program_id(1)

    @pl.when(j == 0)
    def _init():
        sum_l_ref[...] = jnp.zeros_like(sum_l_ref)
        sum_m_ref[...] = jnp.zeros_like(sum_m_ref)

    d = d_ref[...].astype(jnp.float32)
    s = s_ref[...].astype(jnp.float32)
    m = m_ref[...].astype(jnp.float32)
    l = (jnp.abs(d) + s) * m

    if mask_tail:
        # Last row tile overhangs the array: zero out-of-range rows so OOB
        # garbage (possibly NaN) never reaches either sum.
        tile_idx = i * part_off + j
        row_idx = (tile_idx * tile_rows
                   + lax.broadcasted_iota(jnp.int32, l.shape, 0))
        valid = row_idx < rows_valid
        l = jnp.where(valid, l, 0.0)
        m = jnp.where(valid, m, 0.0)

    if mask_dup:
        # Odd tile count: part 1's first tile duplicates part 0's last tile;
        # drop its contribution entirely (keeps every block index in bounds).
        keep = jnp.where(jnp.logical_and(i == 1, j == 0), 0.0, 1.0)
        l = l * keep
        m = m * keep

    groups = tile_rows // 8
    sum_l_ref[...] += l.reshape(groups, 8, _LANE).sum(axis=0)
    sum_m_ref[...] += m.reshape(groups, 8, _LANE).sum(axis=0)


def _laplace_elem_kernel(d_ref, s_ref, m_ref, out_ref):
    """reduction='none': per-element L, lane-dense tile, native dtype out."""
    out_ref[...] = ((jnp.abs(d_ref[...]) + s_ref[...])
                    * m_ref[...]).astype(out_ref.dtype)


# ----------------------------------------------------------------------------
# Wrapper
# ----------------------------------------------------------------------------

def laplace_loss(delta_norm, logstd, M_obs, reduction="mean",
                 max_tile_rows=_MAX_TILE_ROWS):
    orig_shape = delta_norm.shape
    n = int(np.prod(orig_shape)) if len(orig_shape) else 1

    max_tile_rows = max(8, (int(max_tile_rows) // 8) * 8)
    rows = pl.cdiv(n, _LANE)

    if rows <= max_tile_rows:
        # Small: one VMEM-resident tile.  Round rows up to 8 sublanes (cheap,
        # small arrays only); zero-padded M_obs keeps both sums exact.
        rows_p = _round_up(rows, 8)
        tile_rows = rows_p
    else:
        # Large: never copy for the row dim; the partial last tile is masked
        # in-kernel.  Only lane raggedness (n % 128 != 0) forces a pad.
        rows_p = rows
        tile_rows = max_tile_rows

    padded_n = rows_p * _LANE
    needs_pad = padded_n != n

    def to_lane_dense(x):
        flat = jnp.reshape(x, (-1,))
        if needs_pad:
            flat = jnp.pad(flat, (0, padded_n - n))  # zeros -> sums unaffected
        return flat.reshape(rows_p, _LANE)           # free reshape when aligned

    d2 = to_lane_dense(delta_norm)
    s2 = to_lane_dense(logstd)
    m2 = to_lane_dense(M_obs)

    nt = pl.cdiv(rows_p, tile_rows)                  # number of row tiles
    mask_tail = (nt * tile_rows != rows_p)
    in_bytes = n * (delta_norm.dtype.itemsize + logstd.dtype.itemsize
                    + M_obs.dtype.itemsize)

    if reduction == "none":
        out_dtype = jnp.result_type(delta_norm.dtype, logstd.dtype, M_obs.dtype)
        tile_spec = pl.BlockSpec((tile_rows, _LANE), lambda i: (i, 0))
        out = pl.pallas_call(
            _laplace_elem_kernel,
            out_shape=jax.ShapeDtypeStruct((rows_p, _LANE), out_dtype),
            grid=(nt,),
            in_specs=[tile_spec, tile_spec, tile_spec],
            out_specs=tile_spec,
            compiler_params=pltpu.CompilerParams(
                dimension_semantics=("parallel",)),
            cost_estimate=pl.CostEstimate(
                flops=int(3 * n), transcendentals=0,
                bytes_accessed=int(in_bytes + n * out_dtype.itemsize)),
        )(d2, s2, m2)
        if needs_pad:
            return out.reshape(-1)[:n].reshape(orig_shape)
        return out.reshape(orig_shape)

    if reduction not in ("mean", "sum"):
        raise ValueError(f"Unknown reduction '{reduction}'.")

    # Two-part split of the row tiles (parallel across TensorCores on v7x).
    n_split = 2 if nt >= 2 else 1
    steps = pl.cdiv(nt, n_split)        # tiles per part
    part_off = nt - steps               # part 1 covers tiles [nt-steps, nt)
    mask_dup = (n_split * steps != nt)  # odd nt -> one duplicated tile to mask

    in_spec = pl.BlockSpec((tile_rows, _LANE),
                           lambda i, j: (i * part_off + j, 0))
    acc_spec = pl.BlockSpec((8, _LANE), lambda i, j: (i, 0))

    kernel = functools.partial(
        _laplace_sums_kernel, rows_valid=rows_p, tile_rows=tile_rows,
        part_off=part_off, mask_tail=mask_tail, mask_dup=mask_dup)

    partial_l, partial_m = pl.pallas_call(
        kernel,
        out_shape=(jax.ShapeDtypeStruct((8 * n_split, _LANE), jnp.float32),
                   jax.ShapeDtypeStruct((8 * n_split, _LANE), jnp.float32)),
        grid=(n_split, steps),
        in_specs=[in_spec, in_spec, in_spec],
        out_specs=(acc_spec, acc_spec),
        compiler_params=pltpu.CompilerParams(
            dimension_semantics=("parallel", "arbitrary")),
        cost_estimate=pl.CostEstimate(
            flops=int(5 * n), transcendentals=0,
            bytes_accessed=int(in_bytes + 2 * 8 * n_split * _LANE * 4)),
    )(d2, s2, m2)

    sum_l = jnp.sum(partial_l)          # tiny (n_split*8, 128) reduce in XLA
    sum_m = jnp.sum(partial_m)
    if reduction == "sum":
        return sum_l
    return sum_l / sum_m                # 'mean' (no zero-mask guard, as in ref)


laplace_loss_jit = jax.jit(laplace_loss,
                           static_argnames=("reduction", "max_tile_rows"))


# Pure-JAX reference (mirrors the PyTorch module) for correctness checking.
def laplace_loss_ref(delta_norm, logstd, M_obs, reduction="mean"):
    L = (jnp.abs(delta_norm) + logstd) * M_obs
    if reduction == "mean":
        return L.sum() / M_obs.sum()
    if reduction == "sum":
        return L.sum()
    if reduction == "none":
        return L
    raise ValueError(f"Unknown reduction '{reduction}'.")


# ----------------------------------------------------------------------------
# Main
# ----------------------------------------------------------------------------

if __name__ == "__main__":
    key = jax.random.PRNGKey(0)
    ok = True

    # (shape, max_tile_rows).  max_tile_rows=8 forces the multi-tile,
    # two-part-split, tail-mask and duplicate-mask code paths on tiny data.
    test_cases = [
        ((4, 16, 33), _MAX_TILE_ROWS),   # lane-ragged, single tile (pads)
        ((2, 8, 128), _MAX_TILE_ROWS),   # 128-aligned, zero-copy path
        ((4, 5, 128), 8),                # aligned, multi-tile + split + tail mask
        ((4, 16, 33), 8),                # ragged, multi-tile + duplicate mask
    ]

    for shape, mtr in test_cases:
        key, kd, ks, km = jax.random.split(key, 4)
        delta_norm = jax.random.normal(kd, shape, jnp.float32)
        logstd = 0.1 * jax.random.normal(ks, shape, jnp.float32)
        M_obs = (jax.random.uniform(km, shape) < 0.5).astype(jnp.float32)
        # Guarantee M_obs.sum() > 0 so 'mean' is finite.
        M_obs = M_obs.reshape(-1).at[0].set(1.0).reshape(shape)

        for reduction in ("mean", "sum", "none"):
            out = laplace_loss_jit(delta_norm, logstd, M_obs,
                                   reduction=reduction, max_tile_rows=mtr)
            out = jax.block_until_ready(out)
            ref = laplace_loss_ref(delta_norm, logstd, M_obs, reduction)
            ok = ok and (out.dtype == ref.dtype) and (out.shape == ref.shape)
            ok = ok and bool(jnp.all(jnp.isfinite(out)))
            ok = ok and bool(jnp.allclose(out, ref, rtol=1e-5, atol=1e-5))

    assert ok, "Pallas LaplaceLoss does not match the reference."
    print("KERNEL_OK")
</pallas_src>

<mosaic_0001>
module attributes {stable_mosaic.version = 11 : i64} {
  func.func @_laplace_sums_kernel(%arg0: i32, %arg1: i32, %arg2: memref<24x128xf32, #tpu.memory_space<vmem>>, %arg3: memref<24x128xf32, #tpu.memory_space<vmem>>, %arg4: memref<24x128xf32, #tpu.memory_space<vmem>>, %arg5: memref<8x128xf32, #tpu.memory_space<vmem>>, %arg6: memref<8x128xf32, #tpu.memory_space<vmem>>) attributes {dimension_semantics = [#tpu.dimension_semantics<parallel>, #tpu.dimension_semantics<arbitrary>], iteration_bounds = array<i64: 1, 1>, scalar_prefetch = 0 : i64, scratch_operands = 0 : i64, tpu.core_type = #tpu.core_type<tc>, window_params = [{transform_indices = @transform_0, window_bounds = array<i64: 24, 128>}, {transform_indices = @transform_1, window_bounds = array<i64: 24, 128>}, {transform_indices = @transform_2, window_bounds = array<i64: 24, 128>}, {transform_indices = @transform_3, window_bounds = array<i64: 8, 128>}, {transform_indices = @transform_4, window_bounds = array<i64: 8, 128>}]} {
    %c0_i32 = arith.constant 0 : i32
    %0 = arith.cmpi eq, %arg1, %c0_i32 : i32
    %1 = arith.extui %0 : i1 to i32
    %c0_i32_0 = arith.constant 0 : i32
    %2 = arith.cmpi ne, %1, %c0_i32_0 : i32
    scf.if %2 {
      %cst_15 = arith.constant 0.000000e+00 : f32
      %19 = vector.broadcast %cst_15 : f32 to vector<8x128xf32>
      %c0_16 = arith.constant 0 : index
      %c0_17 = arith.constant 0 : index
      %20 = vector.load %arg5[%c0_16, %c0_17] : memref<8x128xf32, #tpu.memory_space<vmem>>, vector<8x128xf32>
      tpu.vector_store %arg5[%c0_16, %c0_17], %19 {strides = array<i32>} : memref<8x128xf32, #tpu.memory_space<vmem>>, vector<8x128xf32>,
      %cst_18 = arith.constant 0.000000e+00 : f32
      %21 = vector.broadcast %cst_18 : f32 to vector<8x128xf32>
      %c0_19 = arith.constant 0 : index
      %c0_20 = arith.constant 0 : index
      %22 = vector.load %arg6[%c0_19, %c0_20] : memref<8x128xf32, #tpu.memory_space<vmem>>, vector<8x128xf32>
      tpu.vector_store %arg6[%c0_19, %c0_20], %21 {strides = array<i32>} : memref<8x128xf32, #tpu.memory_space<vmem>>, vector<8x128xf32>,
    } else {
    }
    %c0 = arith.constant 0 : index
    %c0_1 = arith.constant 0 : index
    %3 = vector.load %arg2[%c0, %c0_1] : memref<24x128xf32, #tpu.memory_space<vmem>>, vector<24x128xf32>
    %c0_2 = arith.constant 0 : index
    %c0_3 = arith.constant 0 : index
    %4 = vector.load %arg3[%c0_2, %c0_3] : memref<24x128xf32, #tpu.memory_space<vmem>>, vector<24x128xf32>
    %c0_4 = arith.constant 0 : index
    %c0_5 = arith.constant 0 : index
    %5 = vector.load %arg4[%c0_4, %c0_5] : memref<24x128xf32, #tpu.memory_space<vmem>>, vector<24x128xf32>
    %6 = math.absf %3 : vector<24x128xf32>
    %7 = arith.addf %6, %4 : vector<24x128xf32>
    %8 = arith.mulf %7, %5 : vector<24x128xf32>
    %c0_6 = arith.constant 0 : index
    %c0_7 = arith.constant 0 : index
    %9 = vector.load %arg5[%c0_6, %c0_7] : memref<8x128xf32, #tpu.memory_space<vmem>>, vector<8x128xf32>
    %10 = vector.shape_cast %8 : vector<24x128xf32> to vector<3x8x128xf32>
    %cst = arith.constant dense<0.000000e+00> : vector<8x128xf32>
    %11 = vector.multi_reduction <add>, %10, %cst [0] : vector<3x8x128xf32> to vector<8x128xf32>
    %12 = arith.addf %9, %11 : vector<8x128xf32>
    %c0_8 = arith.constant 0 : index
    %c0_9 = arith.constant 0 : index
    %13 = vector.load %arg5[%c0_8, %c0_9] : memref<8x128xf32, #tpu.memory_space<vmem>>, vector<8x128xf32>
    tpu.vector_store %arg5[%c0_8, %c0_9], %12 {strides = array<i32>} : memref<8x128xf32, #tpu.memory_space<vmem>>, vector<8x128xf32>,
    %c0_10 = arith.constant 0 : index
    %c0_11 = arith.constant 0 : index
    %14 = vector.load %arg6[%c0_10, %c0_11] : memref<8x128xf32, #tpu.memory_space<vmem>>, vector<8x128xf32>
    %15 = vector.shape_cast %5 : vector<24x128xf32> to vector<3x8x128xf32>
    %cst_12 = arith.constant dense<0.000000e+00> : vector<8x128xf32>
    %16 = vector.multi_reduction <add>, %15, %cst_12 [0] : vector<3x8x128xf32> to vector<8x128xf32>
    %17 = arith.addf %14, %16 : vector<8x128xf32>
    %c0_13 = arith.constant 0 : index
    %c0_14 = arith.constant 0 : index
    %18 = vector.load %arg6[%c0_13, %c0_14] : memref<8x128xf32, #tpu.memory_space<vmem>>, vector<8x128xf32>
    tpu.vector_store %arg6[%c0_13, %c0_14], %17 {strides = array<i32>} : memref<8x128xf32, #tpu.memory_space<vmem>>, vector<8x128xf32>,
    return
  }
  func.func @transform_0(%arg0: i32, %arg1: i32) -> (i32, i32) {
    %c0_i32 = arith.constant 0 : i32
    %0 = arith.muli %arg0, %c0_i32 : i32
    %1 = arith.addi %0, %arg1 : i32
    %c0_i32_0 = arith.constant 0 : i32
    %c0_i32_1 = arith.constant 0 : i32
    return %1, %c0_i32_0 : i32, i32
  }
  func.func @transform_1(%arg0: i32, %arg1: i32) -> (i32, i32) {
    %c0_i32 = arith.constant 0 : i32
    %0 = arith.muli %arg0, %c0_i32 : i32
    %1 = arith.addi %0, %arg1 : i32
    %c0_i32_0 = arith.constant 0 : i32
    %c0_i32_1 = arith.constant 0 : i32
    return %1, %c0_i32_0 : i32, i32
  }
  func.func @transform_2(%arg0: i32, %arg1: i32) -> (i32, i32) {
    %c0_i32 = arith.constant 0 : i32
    %0 = arith.muli %arg0, %c0_i32 : i32
    %1 = arith.addi %0, %arg1 : i32
    %c0_i32_0 = arith.constant 0 : i32
    %c0_i32_1 = arith.constant 0 : i32
    return %1, %c0_i32_0 : i32, i32
  }
  func.func @transform_3(%arg0: i32, %arg1: i32) -> (i32, i32) {
    %c0_i32 = arith.constant 0 : i32
    %c0_i32_0 = arith.constant 0 : i32
    return %arg0, %c0_i32 : i32, i32
  }
  func.func @transform_4(%arg0: i32, %arg1: i32) -> (i32, i32) {
    %c0_i32 = arith.constant 0 : i32
    %c0_i32_0 = arith.constant 0 : i32
    return %arg0, %c0_i32 : i32, i32
  }
}

</mosaic_0001>

<bundles_post_ra>
// kernel: laplace_loss.1
= control target key start
LH: loop header
LB: loop body
LE: loop exit
PB: predicated region body
PF: predicated region fallthrough
CT: control target
= control target key end

     0   :  { %s117_s0 = inlined_call_operand.vmem [shape: f32[24,128], index: 0, kind: input, shape index: {}]   ;;  %s118_s1 = inlined_call_operand.vmem [shape: f32[24,128], index: 1, kind: input, shape index: {}]   ;;  %s119_s2 = inlined_call_operand.vmem [shape: f32[24,128], index: 2, kind: input, shape index: {}]   ;;  %s120_s4 = inlined_call_operand.vmem [shape: f32[8,128], index: 4, kind: output, shape index: {1}]   ;;  %s121_s3 = inlined_call_operand.vmem [shape: f32[8,128], index: 3, kind: output, shape index: {0}]  }
   0x1   :  { %v22_v0 = vld [vmem:[%s117_s0] sm:$0xff]  ;;  %v23_v1 = vld [vmem:[%s117_s0 + $0x8] sm:$0xff]  ;;  %v24_v2 = vld [vmem:[%s117_s0 + $0x10] sm:$0xff] }
   0x2   :  { %v25_v3 = vld [vmem:[%s118_s1] sm:$0xff]  ;;  %v26_v4 = vld [vmem:[%s118_s1 + $0x8] sm:$0xff]  ;;  %v31_v5 = vand.u32 2147483647, %v22_v0  ;;  %v27_v6 = vld [vmem:[%s118_s1 + $0x10] sm:$0xff] }
   0x3   :  { %v28_v7 = vld [vmem:[%s119_s2] sm:$0xff]  ;;  %v29_v8 = vld [vmem:[%s119_s2 + $0x8] sm:$0xff]  ;;  %v32_v9 = vand.u32 2147483647, %v23_v1  ;;  %v33_v10 = vand.u32 2147483647, %v24_v2 }
   0x4   :  { %v34_v11 = vadd.f32 %v31_v5, %v25_v3  ;;  %v46_v12 = vadd.f32 %v29_v8, %v28_v7  ;;  %v30_v13 = vld [vmem:[%s119_s2 + $0x10] sm:$0xff] }
   0x5   :  { %v35_v14 = vadd.f32 %v32_v9, %v26_v4  ;;  %v36_v15 = vadd.f32 %v33_v10, %v27_v6 }
   0x6   :  { %v37_v16 = vmul.f32 %v34_v11, %v28_v7  ;;  %v47_v17 = vadd.f32 %v46_v12, %v30_v13 }
   0x7   :  { %v38_v18 = vmul.f32 %v35_v14, %v29_v8  ;;  %v39_v19 = vmul.f32 %v36_v15, %v30_v13 }
   0x8   :  { %49 = vst [vmem:[%s120_s4] sm:$0xff] %v47_v17 }
   0x9   :  { %v41_v20 = vadd.f32 %v38_v18, %v37_v16 }
   0xb   :  { %v42_v21 = vadd.f32 %v41_v20, %v39_v19 }
   0xd   :  { %44 = vst [vmem:[%s121_s3] sm:$0xff] %v42_v21 }

</bundles_post_ra>
